<compile_context>
chip_gen: v7x
topology: tpu7x:2x2x1
jax: 0.10.0
libtpu: 0.0.40
codegen_flags: <defaults>
</compile_context>

<pallas_src>
import functools

import jax
import jax.numpy as jnp
from jax import lax
from jax.experimental import pallas as pl
from jax.experimental.pallas import tpu as pltpu


def _mha_kernel(x_ref, wf_ref, bf_ref, o_ref, *, batch, seq, num_heads, hidden):
    """Single-invocation kernel (no grid): all batches processed at once.

    x_ref:  (B*S, D)     flattened inputs
    wf_ref: (D, H+NH)    fused [Wv | Wq@Wh] weights
    bf_ref: (1, H+NH)    fused [bv | bq@Wh + bh] bias
    o_ref:  (B, NH*H)    lane-dense output, head-major then hidden
    """
    x = x_ref[...]                                                  # (B*S, D)

    # One fused projection for both V and the per-head scores.
    proj = jnp.dot(x, wf_ref[...],
                   preferred_element_type=jnp.float32) + bf_ref[...]  # (B*S, H+NH)

    # Lane-slice, then split batch/seq (S == 8 is exactly one f32 sublane tile,
    # so these reshapes are layout no-ops).
    v = proj[:, :hidden].reshape(batch, seq, hidden)                # (B, S, H)
    scores = proj[:, hidden:hidden + num_heads].reshape(
        batch, seq, num_heads)                                      # (B, S, NH)

    # Softmax over the sequence axis (torch dim=1), numerically stabilized.
    scores = scores - jnp.max(scores, axis=1, keepdims=True)
    p = jnp.exp(scores)
    attn = p * pl.reciprocal(jnp.sum(p, axis=1, keepdims=True),
                             approx=False)                          # (B, S, NH)

    # Weighted sums for every batch/head in one batched contraction over S
    # (no explicit transpose through the XLU).
    ws = lax.dot_general(attn, v,
                         dimension_numbers=(((1,), (1,)), ((0,), (0,))),
                         preferred_element_type=jnp.float32)        # (B, NH, H)

    # Head-major flatten (B, NH, H) -> (B, NH*H) via lane concatenation.
    o_ref[...] = jnp.concatenate(
        [ws[:, n, :] for n in range(num_heads)], axis=1)            # (B, NH*H)


def multi_head_attention(x, params):
    """x: (B, S, D_in) float32.  Returns (B, num_heads * hidden_size)."""
    B, S, D = x.shape
    wq, bq, wk, bk, wv, bv, wh, bh = params
    del wk, bk  # key projection is dead code in the torch forward
    H = wv.shape[1]
    NH = wh.shape[1]

    # Fold q -> per-head scores into one projection:
    #   (x @ Wq + bq) @ Wh + bh == x @ (Wq @ Wh) + (bq @ Wh + bh)
    wqh = wq @ wh                                                   # (D, NH)
    bqh = bq @ wh + bh                                              # (1, NH)

    # Fuse the V projection and the score projection into a single matmul.
    wf = jnp.concatenate([wv, wqh], axis=1)                         # (D, H+NH)
    bf = jnp.concatenate([bv, bqh], axis=1)                         # (1, H+NH)

    xf = x.reshape(B * S, D)

    kernel = functools.partial(_mha_kernel, batch=B, seq=S,
                               num_heads=NH, hidden=H)

    out = pl.pallas_call(
        kernel,
        out_shape=jax.ShapeDtypeStruct((B, NH * H), jnp.float32),
        # No grid: single invocation, whole arrays resident in VMEM, no
        # pipeline double-buffering overhead.
        in_specs=[
            pl.BlockSpec(memory_space=pltpu.MemorySpace.VMEM),   # x (flattened)
            pl.BlockSpec(memory_space=pltpu.MemorySpace.VMEM),   # fused weights
            pl.BlockSpec(memory_space=pltpu.MemorySpace.VMEM),   # fused bias
        ],
        out_specs=pl.BlockSpec(memory_space=pltpu.MemorySpace.VMEM),
    )(xf, wf, bf)

    return out


def _reference(x, params):
    """Pure-JAX reference mirroring the torch forward."""
    wq, bq, wk, bk, wv, bv, wh, bh = params
    q = x @ wq + bq
    v = x @ wv + bv
    scores = q @ wh + bh                                   # (B, S, NH)
    attn = jax.nn.softmax(scores, axis=1)                  # softmax over seq
    ws = jnp.einsum("bsn,bsh->bnh", attn, v)               # (B, NH, H)
    return ws.reshape(x.shape[0], -1)


def init_params(key, input_size, num_heads, hidden_size):
    ks = jax.random.split(key, 8)
    scale_in = 1.0 / jnp.sqrt(input_size)
    scale_h = 1.0 / jnp.sqrt(hidden_size)
    wq = jax.random.uniform(ks[0], (input_size, hidden_size), jnp.float32,
                            -scale_in, scale_in)
    bq = jax.random.uniform(ks[1], (1, hidden_size), jnp.float32,
                            -scale_in, scale_in)
    wk = jax.random.uniform(ks[2], (input_size, hidden_size), jnp.float32,
                            -scale_in, scale_in)
    bk = jax.random.uniform(ks[3], (1, hidden_size), jnp.float32,
                            -scale_in, scale_in)
    wv = jax.random.uniform(ks[4], (input_size, hidden_size), jnp.float32,
                            -scale_in, scale_in)
    bv = jax.random.uniform(ks[5], (1, hidden_size), jnp.float32,
                            -scale_in, scale_in)
    wh = jax.random.uniform(ks[6], (hidden_size, num_heads), jnp.float32,
                            -scale_h, scale_h)
    bh = jax.random.uniform(ks[7], (1, num_heads), jnp.float32,
                            -scale_h, scale_h)
    return (wq, bq, wk, bk, wv, bv, wh, bh)


if __name__ == "__main__":
    B, S, D_IN = 2, 8, 32
    NUM_HEADS, HIDDEN = 4, 32

    key = jax.random.PRNGKey(0)
    k_x, k_p = jax.random.split(key)
    x = jax.random.normal(k_x, (B, S, D_IN), jnp.float32)
    params = init_params(k_p, D_IN, NUM_HEADS, HIDDEN)

    out = multi_head_attention(x, params)
    out = jax.block_until_ready(out)

    ref = _reference(x, params)
    assert out.shape == (B, NUM_HEADS * HIDDEN), out.shape
    # Wq@Wh is folded in the wrapper, so f32 summation order differs slightly
    # from the reference; tolerance covers that reordering.
    assert jnp.allclose(out, ref, atol=2e-5, rtol=2e-5), "mismatch vs reference"

    print("KERNEL_OK")
</pallas_src>

<mosaic_0001>
module attributes {stable_mosaic.version = 11 : i64} {
  func.func @_mha_kernel(%arg0: memref<16x32xf32, #tpu.memory_space<vmem>>, %arg1: memref<32x36xf32, #tpu.memory_space<vmem>>, %arg2: memref<1x36xf32, #tpu.memory_space<vmem>>, %arg3: memref<2x128xf32, #tpu.memory_space<vmem>>) attributes {dimension_semantics = [], scalar_prefetch = 0 : i64, scratch_operands = 0 : i64, tpu.core_type = #tpu.core_type<tc>} {
    %c0 = arith.constant 0 : index
    %c0_0 = arith.constant 0 : index
    %0 = vector.load %arg0[%c0, %c0_0] : memref<16x32xf32, #tpu.memory_space<vmem>>, vector<16x32xf32>
    %c0_1 = arith.constant 0 : index
    %c0_2 = arith.constant 0 : index
    %1 = vector.load %arg1[%c0_1, %c0_2] : memref<32x36xf32, #tpu.memory_space<vmem>>, vector<32x36xf32>
    %cst = arith.constant dense<0.000000e+00> : vector<16x36xf32>
    %2 = tpu.matmul %0, %1, %cst {dimension_numbers = #tpu.dot_dimension_numbers<[1], [0], [0], [1], [0, 0, 1, 1], [], []>} : vector<16x32xf32>, vector<32x36xf32>, vector<16x36xf32> -> vector<16x36xf32>
    %c0_3 = arith.constant 0 : index
    %c0_4 = arith.constant 0 : index
    %3 = vector.load %arg2[%c0_3, %c0_4] : memref<1x36xf32, #tpu.memory_space<vmem>>, vector<1x36xf32>
    %4 = vector.broadcast %3 : vector<1x36xf32> to vector<16x36xf32>
    %5 = arith.addf %2, %4 : vector<16x36xf32>
    %6 = vector.extract_strided_slice %5 {offsets = [0, 0], sizes = [16, 32], strides = [1, 1]} : vector<16x36xf32> to vector<16x32xf32>
    %7 = vector.shape_cast %6 : vector<16x32xf32> to vector<2x8x32xf32>
    %8 = vector.extract_strided_slice %5 {offsets = [0, 32], sizes = [16, 4], strides = [1, 1]} : vector<16x36xf32> to vector<16x4xf32>
    %9 = vector.shape_cast %8 : vector<16x4xf32> to vector<2x8x4xf32>
    %cst_5 = arith.constant dense<0xFF800000> : vector<2x4xf32>
    %10 = vector.multi_reduction <maximumf>, %9, %cst_5 [1] : vector<2x8x4xf32> to vector<2x4xf32>
    %11 = vector.shape_cast %10 : vector<2x4xf32> to vector<2x1x4xf32>
    %12 = vector.broadcast %11 : vector<2x1x4xf32> to vector<2x8x4xf32>
    %13 = arith.subf %9, %12 : vector<2x8x4xf32>
    %14 = math.exp %13 : vector<2x8x4xf32>
    %cst_6 = arith.constant dense<0.000000e+00> : vector<2x4xf32>
    %15 = vector.multi_reduction <add>, %14, %cst_6 [1] : vector<2x8x4xf32> to vector<2x4xf32>
    %16 = vector.shape_cast %15 : vector<2x4xf32> to vector<2x1x4xf32>
    %17 = tpu.reciprocal %16 : vector<2x1x4xf32> -> vector<2x1x4xf32>
    %18 = vector.broadcast %17 : vector<2x1x4xf32> to vector<2x8x4xf32>
    %19 = arith.mulf %14, %18 : vector<2x8x4xf32>
    %cst_7 = arith.constant dense<0.000000e+00> : vector<2x4x32xf32>
    %20 = tpu.matmul %19, %7, %cst_7 {dimension_numbers = #tpu.dot_dimension_numbers<[1], [1], [2], [2], [0, 0, 0, 2, 1, 2], [0], [0]>} : vector<2x8x4xf32>, vector<2x8x32xf32>, vector<2x4x32xf32> -> vector<2x4x32xf32>
    %21 = vector.extract_strided_slice %20 {offsets = [0, 0, 0], sizes = [2, 1, 32], strides = [1, 1, 1]} : vector<2x4x32xf32> to vector<2x1x32xf32>
    %22 = vector.shape_cast %21 : vector<2x1x32xf32> to vector<2x32xf32>
    %23 = vector.extract_strided_slice %20 {offsets = [0, 1, 0], sizes = [2, 1, 32], strides = [1, 1, 1]} : vector<2x4x32xf32> to vector<2x1x32xf32>
    %24 = vector.shape_cast %23 : vector<2x1x32xf32> to vector<2x32xf32>
    %25 = vector.extract_strided_slice %20 {offsets = [0, 2, 0], sizes = [2, 1, 32], strides = [1, 1, 1]} : vector<2x4x32xf32> to vector<2x1x32xf32>
    %26 = vector.shape_cast %25 : vector<2x1x32xf32> to vector<2x32xf32>
    %27 = vector.extract_strided_slice %20 {offsets = [0, 3, 0], sizes = [2, 1, 32], strides = [1, 1, 1]} : vector<2x4x32xf32> to vector<2x1x32xf32>
    %28 = vector.shape_cast %27 : vector<2x1x32xf32> to vector<2x32xf32>
    %29 = tpu.concatenate %22, %24, %26, %28 in 1 : vector<2x32xf32>, vector<2x32xf32>, vector<2x32xf32>, vector<2x32xf32> -> vector<2x128xf32>
    %c0_8 = arith.constant 0 : index
    %c0_9 = arith.constant 0 : index
    %30 = vector.load %arg3[%c0_8, %c0_9] : memref<2x128xf32, #tpu.memory_space<vmem>>, vector<2x128xf32>
    tpu.vector_store %arg3[%c0_8, %c0_9], %29 {strides = array<i32>} : memref<2x128xf32, #tpu.memory_space<vmem>>, vector<2x128xf32>,
    return
  }
}

</mosaic_0001>

<bundles_post_ra>
// kernel: tpu_custom_call.1
= control target key start
LH: loop header
LB: loop body
LE: loop exit
PB: predicated region body
PF: predicated region fallthrough
CT: control target
= control target key end

     0   :  { %8 = vsyncpa [#allocation3], 0  ;;  %s660_s0 = inlined_call_operand.hbm [shape: f32[16,32], index: 0, kind: input, shape index: {}]   ;;  %s661_s1 = inlined_call_operand.hbm [shape: f32[32,36], index: 1, kind: input, shape index: {}]   ;;  %s662_s2 = inlined_call_operand.vmem [shape: f32[1,36], index: 2, kind: input, shape index: {}]   ;;  %s663_s3 = inlined_call_operand.hbm [shape: f32[2,128], index: 3, kind: output, shape index: {}]  }
   0x1   :  { %9 = vsyncpa [#allocation6], 0 }
   0x2   :  { %10 = vsyncpa [#allocation4], 0  ;;  %s575_s12 = smov [#allocation2]   ;;  %s503_s16 = scalar_lea.hbm %s660_s0, 256 }
   0x3   :  { %s16_s13 = sshll.u32 %s575_s12, 4  ;;  %p504_p0 = scmp.ne.s32.totalorder %s660_s0, %s503_s16  ;;  %s17_s13 = int_to_ptr.vmem [resolvable:$true] %s16_s13 }
   0x4   :  { %p507_p1 = scmp.lt.u32.totalorder %s503_s16, %s660_s0 }
   0x6   :  { %p509_p2 = pnand %p507_p1, %p504_p0 }
   0x8   :  { %512 = shalt.err (!%p509_p2)
}
   0x9   :  { %s513_s21 = scalar_lea.vmem %s17_s13, 256  ;;  %p518_p4 = scmp.lt.s32.totalorder %s17_s13, %s17_s13 }
   0xa   :  { %p514_p3 = scmp.ne.s32.totalorder %s17_s13, %s513_s21  ;;  %p519_p5 = scmp.lt.s32.totalorder %s513_s21, %s513_s21 }
   0xc   :  { %p520_p6 = por %p519_p5, %p518_p4 }
   0xe   :  { %p521_p7 = pnand %p520_p6, %p514_p3 }
  0x10   :  { %524 = shalt.err (!%p521_p7)
}
  0x11   :  { %s576_s22 = smov 128   ;;  %s577_s23 = smov 8  }
  0x12   :  { %22 = dma.hbm_to_vmem [thread:$0]  %s660_s0, 256, %s17_s13, [#allocation3], %s576_s22, %s576_s22, %s577_s23  }
  0x13   :  { %s578_s26 = smov [#allocation5]   ;;  %s525_s30 = scalar_lea.hbm %s661_s1, 512 }
  0x14   :  { %s28_s27 = sshll.u32 %s578_s26, 4  ;;  %p526_p8 = scmp.ne.s32.totalorder %s661_s1, %s525_s30  ;;  %s29_s27 = int_to_ptr.vmem [resolvable:$true] %s28_s27 }
  0x15   :  { %p529_p9 = scmp.lt.u32.totalorder %s525_s30, %s661_s1 }
  0x17   :  { %p531_p10 = pnand %p529_p9, %p526_p8 }
  0x19   :  { %534 = shalt.err (!%p531_p10)
}
  0x1a   :  { %s535_s8 = scalar_lea.vmem %s29_s27, 512  ;;  %p540_p12 = scmp.lt.s32.totalorder %s29_s27, %s29_s27 }
  0x1b   :  { %p536_p11 = scmp.ne.s32.totalorder %s29_s27, %s535_s8  ;;  %p541_p13 = scmp.lt.s32.totalorder %s535_s8, %s535_s8 }
  0x1d   :  { %p542_p0 = por %p541_p13, %p540_p12 }
  0x1f   :  { %p543_p1 = pnand %p542_p0, %p536_p11 }
  0x21   :  { %546 = shalt.err (!%p543_p1)
}
  0x22   :  { %34 = dma.hbm_to_vmem [thread:$0]  %s661_s1, 512, %s29_s27, [#allocation6], %s576_s22, %s576_s22, %s577_s23  }
  0x23   :  { %569 = dma.done.wait [#allocation3], 256  }
  0x24   :  { %570 = vsyncadd [#allocation3], 4294967040 }
  0x25   :  { %571 = dma.done.wait [#allocation6], 512  }
  0x26   :  { %572 = vsyncadd [#allocation6], 4294966784  ;;  %vm56_vm0 = vcmask 261120   ;;  %v45_v0 = vld [vmem:[#allocation5] sm:$0xff]  ;;  %v46_v1 = vld [vmem:[#allocation5 + $0x8] sm:$0xff]  ;;  %v579_v8 = vmov 0.0  }
  0x27   :  { %v47_v2 = vld [vmem:[#allocation5 + $0x10] sm:$0xff]  ;;  %v477_v3 = vpack.c.bf16 %v46_v1, %v45_v0  ;;  %v48_v4 = vld [vmem:[#allocation5 + $0x18] sm:$0xff]  ;;  %467 = vmatprep.subr.mxu1 %v579_v8  ;;  %vm138_vm1 = vcmask 294144   ;;  %vm580_vm2 = vmmov 0   ;;  %vm213_vm3 = vcmask 64512   ;;  %s582_s11 = smov 32  }
  0x28   :  { %v43_v5 = vld [vmem:[#allocation2] sm:$0xff]  ;;  %v481_v6 = vpack.c.bf16 %v48_v4, %v47_v2  ;;  %v44_v7 = vld [vmem:[#allocation2 + $0x8] sm:$0xff]  ;;  %469 = vmatprep.mubr.msk.f32.mxu1 %vm580_vm2, %v579_v8  ;;  %vm399_vm4 = vcmask 1041409   ;;  %s583_s12 = smov 64   ;;  %vm420_vm5 = vcmask 523264   ;;  %s584_s13 = smov [#allocation7]  }
  0x29   :  { %464 = vmatprep.mubr.msk.f32.mxu0 %vm56_vm0, %v43_v5  ;;  %478 = vmatprep.subr.bf16.mxu0 %v477_v3  ;;  %v441_v9 = vld [vmem:[%s662_s2] ss:$0 sm:$0xff]  ;;  %s581_s2 = smov 96   ;;  %s431_s14 = sshll.u32 %s584_s13, 4  ;;  %vm422_vm6 = vcmask 785408   ;;  %s432_s14 = int_to_ptr.vmem [resolvable:$true] %s431_s14 }
  0x2a   :  { %480 = vmatpush3.bf16.msra.mxu0 %v477_v3  ;;  %s547_s15 = scalar_lea.vmem %s432_s14, 32  ;;  %p552_p3 = scmp.lt.s32.totalorder %s432_s14, %s432_s14 }
  0x2b   :  { %482 = vmatprep.subr.bf16.mxu0 %v481_v6  ;;  %p548_p2 = scmp.ne.s32.totalorder %s432_s14, %s547_s15  ;;  %p553_p4 = scmp.lt.s32.totalorder %s547_s15, %s547_s15 }
  0x2d   :  { %p554_p5 = por %p553_p4, %p552_p3 }
  0x2e   :  { %484 = vmatpush3.bf16.msra.mxu0 %v481_v6 }
  0x2f   :  { %p555_p6 = pnand %p554_p5, %p548_p2 }
  0x31   :  { %465 = vmatmul.mubr.msk.f32.vlgmr.msra.gmra.mrb[0].mxu0 %vm56_vm0, %v44_v7 }
 0x104   :  { %v466_v10 = vpop.f32.mrb[0].mxu0 }
 0x105   :  { %v135_v11 = vadd.f32 %v466_v10, %v441_v9  ;;  %v129_v12 = vpop.f32.mrb[1].mxu0 }
 0x106   :  { %v130_v13 = vadd.f32 %v441_v9, %v129_v12 }
 0x107   :  { %v146_v14 = vsel %vm138_vm1, %v135_v11, -inf }
 0x108   :  { %v147_v15 = vrot.slane %v146_v14, 4  ;;  %v139_v16 = vsel %vm138_vm1, %v130_v13, -inf  ;;  %468 = vmatpush3.msra.mxu1 %v130_v13 }
 0x109   :  { %v140_v17 = vrot.slane %v139_v16, 4  ;;  %472 = vmatprep.subr.mxu1 %v579_v8 }
 0x10a   :  { %v148_v18 = vmax.f32 %v146_v14, %v147_v15 }
 0x10b   :  { %v141_v19 = vmax.f32 %v139_v16, %v140_v17 }
 0x10c   :  { %v149_v20 = vrot.slane %v148_v18, 2 }
 0x10d   :  { %v142_v21 = vrot.slane %v141_v19, 2 }
 0x10e   :  { %v150_v22 = vmax.f32 %v148_v18, %v149_v20 }
 0x10f   :  { %v143_v23 = vmax.f32 %v141_v19, %v142_v21 }
 0x110   :  { %v151_v24 = vrot.slane %v150_v22, 1 }
 0x111   :  { %v144_v25 = vrot.slane %v143_v23, 1 }
 0x112   :  { %v152_v26 = vmax.f32 %v150_v22, %v151_v24 }
 0x113   :  { %v145_v27 = vmax.f32 %v143_v23, %v144_v25 }
 0x114   :  { %v154_v28 = vsub.f32 %v135_v11, %v152_v26 }
 0x115   :  { %v153_v29 = vsub.f32 %v130_v13, %v145_v27 }
 0x116   :  { %v157_v30 = vmul.f32 1.442695, %v154_v28 }
 0x117   :  { %v155_v31 = vmul.f32 1.442695, %v153_v29 }
 0x118   :  { %495 = vpow2.f32 %v157_v30 }
 0x119   :  { %497 = vpow2.f32 %v155_v31 }
 0x122   :  { %v496_v32 = vpop.eup %495 }
 0x123   :  { %v498_v33 = vpop.eup %497  ;;  %v166_v34 = vsel %vm138_vm1, %v496_v32, 0.0 }
 0x124   :  { %v167_v35 = vrot.slane %v166_v34, 4  ;;  %v159_v36 = vsel %vm138_vm1, %v498_v33, 0.0 }
 0x125   :  { %v160_v37 = vrot.slane %v159_v36, 4 }
 0x126   :  { %v168_v38 = vadd.f32 %v167_v35, %v166_v34 }
 0x127   :  { %v161_v39 = vadd.f32 %v160_v37, %v159_v36 }
 0x128   :  { %v169_v40 = vrot.slane %v168_v38, 2 }
 0x129   :  { %v162_v41 = vrot.slane %v161_v39, 2 }
 0x12a   :  { %v170_v42 = vadd.f32 %v169_v40, %v168_v38 }
 0x12b   :  { %v163_v43 = vadd.f32 %v162_v41, %v161_v39 }
 0x12c   :  { %v171_v44 = vrot.slane %v170_v42, 1 }
 0x12d   :  { %v164_v45 = vrot.slane %v163_v43, 1 }
 0x12e   :  { %v172_v47 = vadd.f32 %v171_v44, %v170_v42 }
 0x12f   :  { %v165_v46 = vadd.f32 %v164_v45, %v163_v43 }
 0x131   :  { %499 = vrcp.f32 %v165_v46 }
 0x132   :  { %501 = vrcp.f32 %v172_v47 }
 0x13b   :  { %v500_v48 = vpop.eup %499 }
 0x13c   :  { %v175_v49 = vmul.f32 %v500_v48, %v498_v33  ;;  %v502_v50 = vpop.eup %501 }
 0x13d   :  { %v176_v51 = vmul.f32 %v502_v50, %v496_v32 }
 0x13e   :  { %178 = vrot.lane.b32.xlu0 %v175_v49, %s581_s2 }
 0x142   :  { %288 = vrot.lane.b32.xlu0 %v176_v51, %s581_s2 }
 0x1b0   :  { %v179_v52 = vpop.permute.xlu0 %178 }
 0x1b1   :  { %181 = vxpose.xlu1.b32.start.end [1/1] (short) (narrow) %v179_v52, 8 }
 0x1b4   :  { %v289_v53 = vpop.permute.xlu0 %288 }
 0x1b5   :  { %291 = vxpose.xlu1.b32.start.end [1/1] (short) (narrow) %v289_v53, 8 }
 0x231   :  { %v197_v54 = vpop.trf.xlu1 }
 0x232   :  { %470 = vmatmul.mubr.msk.f32.vlgmr.msra.gmra.mrb[0].mxu1 %vm213_vm3, %v197_v54 }
 0x233   :  { %473 = vmatpush3.msra.mxu1 %v135_v11  ;;  %474 = vmatprep.mubr.msk.f32.mxu1 %vm580_vm2, %v579_v8 }
 0x235   :  { %v307_v55 = vpop.trf.xlu1 }
 0x236   :  { %475 = vmatmul.mubr.msk.f32.vlgmr.msra.gmra.mrb[2].mxu1 %vm213_vm3, %v307_v55 }
 0x305   :  { %v283_v56 = vpop.f32.mrb[0].mxu1 }
 0x306   :  { %v471_v57 = vpop.f32.mrb[1].mxu1  ;;  %v402_v58 = vrot.slane %v283_v56, 1  ;;  %v407_v59 = vrot.slane %v283_v56, 2  ;;  %v413_v60 = vrot.slane %v283_v56, 3 }
 0x309   :  { %v392_v61 = vpop.f32.mrb[2].mxu1 }
 0x30a   :  { %v398_v62 = vrot.slane %v392_v61, 7  ;;  %v408_v63 = vrot.slane %v392_v61, 1  ;;  %v414_v0 = vrot.slane %v392_v61, 2  ;;  %v476_v1 = vpop.f32.mrb[3].mxu1  ;;  %v403_v2 = vsel %vm399_vm4, %v392_v61, %v402_v58 }
 0x30b   :  { %404 = vrot.lane.b32.xlu0 %v403_v2, %s582_s11 }
 0x30c   :  { %v409_v3 = vsel %vm399_vm4, %v408_v63, %v407_v59  ;;  %v415_v4 = vsel %vm399_vm4, %v414_v0, %v413_v60  ;;  %v400_v5 = vsel %vm399_vm4, %v398_v62, %v283_v56 }
 0x30d   :  { %410 = vrot.lane.b32.xlu1 %v409_v3, %s583_s12 }
 0x30f   :  { %416 = vrot.lane.b32.xlu0 %v415_v4, %s581_s2 }
 0x37d   :  { %v405_v6 = vpop.permute.xlu0 %404 }
 0x37e   :  { %v419_v7 = vsel %vm56_vm0, %v400_v5, %v405_v6 }
 0x37f   :  { %v411_v8 = vpop.permute.xlu1 %410 }
 0x380   :  { %v421_v9 = vsel %vm420_vm5, %v419_v7, %v411_v8 }
 0x381   :  { %v417_v10 = vpop.permute.xlu0 %416 }
 0x382   :  { %v423_v11 = vsel %vm422_vm6, %v421_v9, %v417_v10 }
 0x383   :  { %424 = vst [vmem:[#allocation7] sm:$0x3] %v423_v11 }
 0x384   :  { %558 = shalt.err (!%p555_p6)
}
 0x385   :  { %s559_s18 = scalar_lea.hbm %s663_s3, 32 }
 0x386   :  { %p560_p7 = scmp.ne.s32.totalorder %s663_s3, %s559_s18  ;;  %p563_p8 = scmp.lt.u32.totalorder %s559_s18, %s663_s3 }
 0x388   :  { %p565_p9 = pnand %p563_p8, %p560_p7 }
 0x38a   :  { %568 = shalt.err (!%p565_p9)
}
 0x38b   :  { %434 = dma.vmem_to_hbm [thread:$0]  %s432_s14, 32, %s663_s3, [#allocation4]  }
 0x38c   :  { %573 = dma.done.wait [#allocation4], 32  }
 0x38d   :  { %574 = vsyncadd [#allocation4], 4294967264 }
 0x38e   :  { %438 = vsyncpa [#allocation3], 1 }
 0x38f   :  { %439 = vsyncpa [#allocation6], 1 }
 0x390   :  { %440 = vsyncpa [#allocation4], 1 }

</bundles_post_ra>
